<compile_context>
chip_gen: v6e
topology: v6e:2x2x1
jax: 0.10.0
libtpu: 0.0.40
codegen_flags: <defaults>
</compile_context>

<pallas_src>
import functools

import numpy as np

import jax
import jax.numpy as jnp
from jax.experimental import pallas as pl
from jax.experimental.pallas import tpu as pltpu


def _elu_p1(x):
    # elu(x) + 1, written explicitly for a clean Mosaic lowering.
    return jnp.where(x > 0, x + 1.0, jnp.exp(x))


def _recurrent_attention_kernel(
    x_ref, w1_ref, b1_ref, w2_ref, b2_ref, s_ref, z_ref,
    rep_ref, til_ref, red_ref, seg_ref,
    y_ref, s_out_ref, z_out_ref,
    *, d_keys, eps,
):
    # x:   (bn, D)
    # w1:  (D, 3*d_keys)        b1: (1, 3*d_keys)     -> c_attn
    # w2:  (d_keys, D)          b2: (1, D)            -> c_proj
    # s:   (bn, d_keys*Dh)  flat state, column c = h*Dh^2 + d*Dh + m
    # z:   (bn, d_keys)
    # rep: (d_keys, d_keys*Dh)  rep[i, c] = [i == c // Dh]
    # til: (d_keys, d_keys*Dh)  til[i, c] = [i == (c // Dh^2)*Dh + c % Dh]
    # red: (d_keys*Dh, d_keys)  red = til.T
    # seg: (d_keys, d_keys)     seg[i, j] = [i // Dh == j // Dh]
    x = x_ref[...]

    # ---- c_attn: one MXU matmul, bias added once. ----
    proj = jnp.dot(x, w1_ref[...], preferred_element_type=jnp.float32) + b1_ref[...]

    # Fused elu+1 feature map on the concatenated q|k slab (one wide VPU/EUP pass).
    qk = _elu_p1(proj[:, : 2 * d_keys])
    pq = qk[:, :d_keys]
    pk = qk[:, d_keys:]
    v = proj[:, 2 * d_keys:]

    # ---- Z update: Z_new = Z + phi(k), lane-dense, single store. ----
    z_new = z_ref[...] + pk
    z_out_ref[...] = z_new

    # ---- S update: S_new[n,h,d,m] = S + phi(k)[n,h,d] * v[n,h,m], all heads at once.
    # Expansions to the flat (d, m) layout ride the MXU (exact 0/1 selection).
    pk_rep = jnp.dot(pk, rep_ref[...], preferred_element_type=jnp.float32)
    pq_rep = jnp.dot(pq, rep_ref[...], preferred_element_type=jnp.float32)
    v_til = jnp.dot(v, til_ref[...], preferred_element_type=jnp.float32)

    s_new = s_ref[...] + pk_rep * v_til        # one wide FMA
    s_out_ref[...] = s_new                     # one lane-dense store

    # num[n, h*Dh+m] = sum_d phi(q)[n,h,d] * S_new[n,h,d,m]   (reduce via MXU)
    num = jnp.dot(pq_rep * s_new, red_ref[...], preferred_element_type=jnp.float32)
    # den[n, h*Dh+m] = sum_d phi(q)[n,h,d] * Z_new[n,h,d]  (block-diag ones matmul
    # yields the denominator already broadcast across each head's value lanes).
    den = jnp.dot(pq * z_new, seg_ref[...], preferred_element_type=jnp.float32) + eps

    out = num * pl.reciprocal(den, approx=False)    # EUP reciprocal, not VPU divide

    # ---- c_proj: single matmul over all heads. ----
    y_ref[...] = jnp.dot(out, w2_ref[...], preferred_element_type=jnp.float32) + b2_ref[...]


@functools.lru_cache(maxsize=None)
def _expanders(d_keys, d_head):
    """Constant 0/1 expansion/reduction matrices for the flat state layout."""
    f = d_keys * d_head
    col = np.arange(f)
    row = np.arange(d_keys)
    rep = (row[:, None] == (col[None, :] // d_head)).astype(np.float32)
    til_row = (col // (d_head * d_head)) * d_head + (col % d_head)
    til = (row[:, None] == til_row[None, :]).astype(np.float32)
    red = np.ascontiguousarray(til.T)
    seg = ((row[:, None] // d_head) == (row[None, :] // d_head)).astype(np.float32)
    return rep, til, red, seg


def _pick_block_n(n):
    if n <= 512:
        return n
    for bn in (512, 256, 128):
        if n % bn == 0:
            return bn
    return n


@functools.partial(jax.jit, static_argnames=("n_heads",))
def recurrent_attention_layer(x, params, state, *, n_heads):
    """x: (N, 1, D); state = (S, Z) with S:(N,H,Dh,Dh), Z:(N,H,Dh).

    Returns (y, (S_new, Z_new)) with y: (N, D).  State is carried through the
    kernel as a row-major flatten (no transposes) and updated in place."""
    w1 = params["c_attn_w"]      # (D, 3*d_keys)
    b1 = params["c_attn_b"]      # (3*d_keys,)
    w2 = params["c_proj_w"]      # (d_keys, D)
    b2 = params["c_proj_b"]      # (D,)

    n, _, d_model = x.shape
    d_keys = w1.shape[1] // 3
    d_head = d_keys // n_heads
    f_state = d_keys * d_head
    eps = 1e-6

    s0, z0 = state
    x2 = x[:, 0, :]                           # squeeze(dim=1)
    s_flat = s0.reshape(n, f_state)           # contiguous reshape, no transpose
    z_flat = z0.reshape(n, d_keys)
    b1_2 = b1.reshape(1, -1)
    b2_2 = b2.reshape(1, -1)

    rep, til, red, seg = (jnp.asarray(a) for a in _expanders(d_keys, d_head))

    bn = _pick_block_n(n)
    grid = (n // bn,)

    def batched(cols):
        return pl.BlockSpec((bn, cols), lambda i: (i, 0))

    def full(shape):
        nd = len(shape)
        return pl.BlockSpec(shape, lambda i, _nd=nd: (0,) * _nd)

    kernel = functools.partial(_recurrent_attention_kernel, d_keys=d_keys, eps=eps)

    y, s_new, z_new = pl.pallas_call(
        kernel,
        grid=grid,
        in_specs=[
            batched(d_model),                 # x
            full((d_model, 3 * d_keys)),      # w1
            full((1, 3 * d_keys)),            # b1
            full((d_keys, d_model)),          # w2
            full((1, d_model)),               # b2
            batched(f_state),                 # S (flat)
            batched(d_keys),                  # Z (flat)
            full((d_keys, f_state)),          # rep
            full((d_keys, f_state)),          # til
            full((f_state, d_keys)),          # red
            full((d_keys, d_keys)),           # seg
        ],
        out_specs=[
            batched(d_model),                 # y
            batched(f_state),                 # S_new
            batched(d_keys),                  # Z_new
        ],
        out_shape=[
            jax.ShapeDtypeStruct((n, d_model), jnp.float32),
            jax.ShapeDtypeStruct((n, f_state), jnp.float32),
            jax.ShapeDtypeStruct((n, d_keys), jnp.float32),
        ],
        input_output_aliases={5: 1, 6: 2},    # S, Z updated in place
        compiler_params=pltpu.CompilerParams(
            dimension_semantics=("parallel",)),
    )(x2, w1, b1_2, w2, b2_2, s_flat, z_flat, rep, til, red, seg)

    s_out = s_new.reshape(n, n_heads, d_head, d_head)
    z_out = z_new.reshape(n, n_heads, d_head)
    return y, (s_out, z_out)


def _reference(x, params, state, *, n_heads):
    """Pure-JAX reference mirroring the PyTorch forward."""
    w1, b1 = params["c_attn_w"], params["c_attn_b"]
    w2, b2 = params["c_proj_w"], params["c_proj_b"]
    s0, z0 = state
    proj = jnp.einsum("nld,df->nlf", x, w1) + b1
    q, k, v = jnp.split(proj, 3, axis=2)
    q, k, v = q[:, 0], k[:, 0], v[:, 0]
    n = q.shape[0]
    q = q.reshape(n, n_heads, -1)
    k = k.reshape(n, n_heads, -1)
    v = v.reshape(n, n_heads, -1)
    pq = _elu_p1(q)
    pk = _elu_p1(k)
    s1 = s0 + jnp.einsum("nhd,nhm->nhdm", pk, v)
    z1 = z0 + pk
    num = jnp.einsum("nhd,nhdm->nhm", pq, s1)
    den = jnp.einsum("nhd,nhd->nh", pq, z1) + 1e-6
    out = (num / den[..., None]).reshape(n, -1)
    y = out @ w2 + b2
    return y, (s1, z1)


if __name__ == "__main__":
    key = jax.random.PRNGKey(0)
    n, d_model, n_heads = 8, 32, 4
    d_keys = d_model // n_heads          # default d_keys = d_model // n_heads = 8
    d_head = d_keys // n_heads           # per-head dim after view(N, H, -1) = 2
    init_scale = 1.0

    k1, k2, k3, k4, k5 = jax.random.split(key, 5)
    params = {
        "c_attn_w": 0.02 * init_scale
        * jax.random.normal(k1, (d_model, 3 * d_keys), jnp.float32),
        "c_attn_b": jnp.zeros((3 * d_keys,), jnp.float32),
        "c_proj_w": 0.02 * init_scale
        * jax.random.normal(k2, (d_keys, d_model), jnp.float32),  # zero_out=False
        "c_proj_b": jnp.zeros((d_model,), jnp.float32),
    }

    x = jax.random.normal(k3, (n, 1, d_model), jnp.float32)
    # Non-trivial previous recurrent state (check_state(None) would be zeros).
    s0 = 0.1 * jax.random.normal(k4, (n, n_heads, d_head, d_head), jnp.float32)
    z0 = 0.1 * jnp.abs(jax.random.normal(k5, (n, n_heads, d_head), jnp.float32))

    # TODO(synk): EventDispatcher / check_state(memory) deprecation plumbing has
    # no compute and is not reproduced.

    y, (s1, z1) = recurrent_attention_layer(x, params, (s0, z0), n_heads=n_heads)
    jax.block_until_ready((y, s1, z1))

    y_r, (s1_r, z1_r) = _reference(x, params, (s0, z0), n_heads=n_heads)
    assert jnp.allclose(y, y_r, rtol=1e-4, atol=1e-5), "output mismatch"
    assert jnp.allclose(s1, s1_r, rtol=1e-4, atol=1e-5), "state S mismatch"
    assert jnp.allclose(z1, z1_r, rtol=1e-4, atol=1e-5), "state Z mismatch"

    print("KERNEL_OK")
</pallas_src>

<mosaic_0001>
module attributes {stable_mosaic.version = 11 : i64} {
  func.func @_recurrent_attention_kernel(%arg0: i32, %arg1: memref<8x32xf32, #tpu.memory_space<vmem>>, %arg2: memref<32x24xf32, #tpu.memory_space<vmem>>, %arg3: memref<1x24xf32, #tpu.memory_space<vmem>>, %arg4: memref<8x32xf32, #tpu.memory_space<vmem>>, %arg5: memref<1x32xf32, #tpu.memory_space<vmem>>, %arg6: memref<8x16xf32, #tpu.memory_space<vmem>>, %arg7: memref<8x8xf32, #tpu.memory_space<vmem>>, %arg8: memref<8x16xf32, #tpu.memory_space<vmem>>, %arg9: memref<8x16xf32, #tpu.memory_space<vmem>>, %arg10: memref<16x8xf32, #tpu.memory_space<vmem>>, %arg11: memref<8x8xf32, #tpu.memory_space<vmem>>, %arg12: memref<8x32xf32, #tpu.memory_space<vmem>>, %arg13: memref<8x16xf32, #tpu.memory_space<vmem>>, %arg14: memref<8x8xf32, #tpu.memory_space<vmem>>) attributes {dimension_semantics = [#tpu.dimension_semantics<parallel>], iteration_bounds = array<i64: 1>, scalar_prefetch = 0 : i64, scratch_operands = 0 : i64, tpu.core_type = #tpu.core_type<tc>, window_params = [{transform_indices = @transform_0, window_bounds = array<i64: 8, 32>}, {pipeline_mode = #tpu.pipeline_mode<synchronous>, transform_indices = @transform_1, window_bounds = array<i64: 32, 24>}, {pipeline_mode = #tpu.pipeline_mode<synchronous>, transform_indices = @transform_2, window_bounds = array<i64: 1, 24>}, {pipeline_mode = #tpu.pipeline_mode<synchronous>, transform_indices = @transform_3, window_bounds = array<i64: 8, 32>}, {pipeline_mode = #tpu.pipeline_mode<synchronous>, transform_indices = @transform_4, window_bounds = array<i64: 1, 32>}, {transform_indices = @transform_5, window_bounds = array<i64: 8, 16>}, {transform_indices = @transform_6, window_bounds = array<i64: 8, 8>}, {pipeline_mode = #tpu.pipeline_mode<synchronous>, transform_indices = @transform_7, window_bounds = array<i64: 8, 16>}, {pipeline_mode = #tpu.pipeline_mode<synchronous>, transform_indices = @transform_8, window_bounds = array<i64: 8, 16>}, {pipeline_mode = #tpu.pipeline_mode<synchronous>, transform_indices = @transform_9, window_bounds = array<i64: 16, 8>}, {pipeline_mode = #tpu.pipeline_mode<synchronous>, transform_indices = @transform_10, window_bounds = array<i64: 8, 8>}, {transform_indices = @transform_11, window_bounds = array<i64: 8, 32>}, {transform_indices = @transform_12, window_bounds = array<i64: 8, 16>}, {transform_indices = @transform_13, window_bounds = array<i64: 8, 8>}]} {
    %c0 = arith.constant 0 : index
    %c0_0 = arith.constant 0 : index
    %0 = vector.load %arg1[%c0, %c0_0] : memref<8x32xf32, #tpu.memory_space<vmem>>, vector<8x32xf32>
    %c0_1 = arith.constant 0 : index
    %c0_2 = arith.constant 0 : index
    %1 = vector.load %arg2[%c0_1, %c0_2] : memref<32x24xf32, #tpu.memory_space<vmem>>, vector<32x24xf32>
    %cst = arith.constant dense<0.000000e+00> : vector<8x24xf32>
    %2 = tpu.matmul %0, %1, %cst {dimension_numbers = #tpu.dot_dimension_numbers<[1], [0], [0], [1], [0, 0, 1, 1], [], []>} : vector<8x32xf32>, vector<32x24xf32>, vector<8x24xf32> -> vector<8x24xf32>
    %c0_3 = arith.constant 0 : index
    %c0_4 = arith.constant 0 : index
    %3 = vector.load %arg3[%c0_3, %c0_4] : memref<1x24xf32, #tpu.memory_space<vmem>>, vector<1x24xf32>
    %4 = vector.broadcast %3 : vector<1x24xf32> to vector<8x24xf32>
    %5 = arith.addf %2, %4 : vector<8x24xf32>
    %6 = vector.extract_strided_slice %5 {offsets = [0, 0], sizes = [8, 16], strides = [1, 1]} : vector<8x24xf32> to vector<8x16xf32>
    %cst_5 = arith.constant 0.000000e+00 : f32
    %7 = vector.broadcast %cst_5 : f32 to vector<8x16xf32>
    %8 = arith.cmpf ogt, %6, %7 : vector<8x16xf32>
    %cst_6 = arith.constant 1.000000e+00 : f32
    %9 = vector.broadcast %cst_6 : f32 to vector<8x16xf32>
    %10 = arith.addf %6, %9 : vector<8x16xf32>
    %11 = math.exp %6 : vector<8x16xf32>
    %12 = arith.select %8, %10, %11 : vector<8x16xi1>, vector<8x16xf32>
    %13 = vector.extract_strided_slice %12 {offsets = [0, 0], sizes = [8, 8], strides = [1, 1]} : vector<8x16xf32> to vector<8x8xf32>
    %14 = vector.extract_strided_slice %12 {offsets = [0, 8], sizes = [8, 8], strides = [1, 1]} : vector<8x16xf32> to vector<8x8xf32>
    %15 = vector.extract_strided_slice %5 {offsets = [0, 16], sizes = [8, 8], strides = [1, 1]} : vector<8x24xf32> to vector<8x8xf32>
    %c0_7 = arith.constant 0 : index
    %c0_8 = arith.constant 0 : index
    %16 = vector.load %arg7[%c0_7, %c0_8] : memref<8x8xf32, #tpu.memory_space<vmem>>, vector<8x8xf32>
    %17 = arith.addf %16, %14 : vector<8x8xf32>
    %c0_9 = arith.constant 0 : index
    %c0_10 = arith.constant 0 : index
    %18 = vector.load %arg14[%c0_9, %c0_10] : memref<8x8xf32, #tpu.memory_space<vmem>>, vector<8x8xf32>
    tpu.vector_store %arg14[%c0_9, %c0_10], %17 {strides = array<i32>} : memref<8x8xf32, #tpu.memory_space<vmem>>, vector<8x8xf32>,
    %c0_11 = arith.constant 0 : index
    %c0_12 = arith.constant 0 : index
    %19 = vector.load %arg8[%c0_11, %c0_12] : memref<8x16xf32, #tpu.memory_space<vmem>>, vector<8x16xf32>
    %cst_13 = arith.constant dense<0.000000e+00> : vector<8x16xf32>
    %20 = tpu.matmul %14, %19, %cst_13 {dimension_numbers = #tpu.dot_dimension_numbers<[1], [0], [0], [1], [0, 0, 1, 1], [], []>} : vector<8x8xf32>, vector<8x16xf32>, vector<8x16xf32> -> vector<8x16xf32>
    %c0_14 = arith.constant 0 : index
    %c0_15 = arith.constant 0 : index
    %21 = vector.load %arg8[%c0_14, %c0_15] : memref<8x16xf32, #tpu.memory_space<vmem>>, vector<8x16xf32>
    %cst_16 = arith.constant dense<0.000000e+00> : vector<8x16xf32>
    %22 = tpu.matmul %13, %21, %cst_16 {dimension_numbers = #tpu.dot_dimension_numbers<[1], [0], [0], [1], [0, 0, 1, 1], [], []>} : vector<8x8xf32>, vector<8x16xf32>, vector<8x16xf32> -> vector<8x16xf32>
    %c0_17 = arith.constant 0 : index
    %c0_18 = arith.constant 0 : index
    %23 = vector.load %arg9[%c0_17, %c0_18] : memref<8x16xf32, #tpu.memory_space<vmem>>, vector<8x16xf32>
    %cst_19 = arith.constant dense<0.000000e+00> : vector<8x16xf32>
    %24 = tpu.matmul %15, %23, %cst_19 {dimension_numbers = #tpu.dot_dimension_numbers<[1], [0], [0], [1], [0, 0, 1, 1], [], []>} : vector<8x8xf32>, vector<8x16xf32>, vector<8x16xf32> -> vector<8x16xf32>
    %c0_20 = arith.constant 0 : index
    %c0_21 = arith.constant 0 : index
    %25 = vector.load %arg6[%c0_20, %c0_21] : memref<8x16xf32, #tpu.memory_space<vmem>>, vector<8x16xf32>
    %26 = arith.mulf %20, %24 : vector<8x16xf32>
    %27 = arith.addf %25, %26 : vector<8x16xf32>
    %c0_22 = arith.constant 0 : index
    %c0_23 = arith.constant 0 : index
    %28 = vector.load %arg13[%c0_22, %c0_23] : memref<8x16xf32, #tpu.memory_space<vmem>>, vector<8x16xf32>
    tpu.vector_store %arg13[%c0_22, %c0_23], %27 {strides = array<i32>} : memref<8x16xf32, #tpu.memory_space<vmem>>, vector<8x16xf32>,
    %29 = arith.mulf %22, %27 : vector<8x16xf32>
    %c0_24 = arith.constant 0 : index
    %c0_25 = arith.constant 0 : index
    %30 = vector.load %arg10[%c0_24, %c0_25] : memref<16x8xf32, #tpu.memory_space<vmem>>, vector<16x8xf32>
    %cst_26 = arith.constant dense<0.000000e+00> : vector<8x8xf32>
    %31 = tpu.matmul %29, %30, %cst_26 {dimension_numbers = #tpu.dot_dimension_numbers<[1], [0], [0], [1], [0, 0, 1, 1], [], []>} : vector<8x16xf32>, vector<16x8xf32>, vector<8x8xf32> -> vector<8x8xf32>
    %32 = arith.mulf %13, %17 : vector<8x8xf32>
    %c0_27 = arith.constant 0 : index
    %c0_28 = arith.constant 0 : index
    %33 = vector.load %arg11[%c0_27, %c0_28] : memref<8x8xf32, #tpu.memory_space<vmem>>, vector<8x8xf32>
    %cst_29 = arith.constant dense<0.000000e+00> : vector<8x8xf32>
    %34 = tpu.matmul %32, %33, %cst_29 {dimension_numbers = #tpu.dot_dimension_numbers<[1], [0], [0], [1], [0, 0, 1, 1], [], []>} : vector<8x8xf32>, vector<8x8xf32>, vector<8x8xf32> -> vector<8x8xf32>
    %cst_30 = arith.constant 9.99999997E-7 : f32
    %35 = vector.broadcast %cst_30 : f32 to vector<8x8xf32>
    %36 = arith.addf %34, %35 : vector<8x8xf32>
    %37 = tpu.reciprocal %36 : vector<8x8xf32> -> vector<8x8xf32>
    %38 = arith.mulf %31, %37 : vector<8x8xf32>
    %c0_31 = arith.constant 0 : index
    %c0_32 = arith.constant 0 : index
    %39 = vector.load %arg4[%c0_31, %c0_32] : memref<8x32xf32, #tpu.memory_space<vmem>>, vector<8x32xf32>
    %cst_33 = arith.constant dense<0.000000e+00> : vector<8x32xf32>
    %40 = tpu.matmul %38, %39, %cst_33 {dimension_numbers = #tpu.dot_dimension_numbers<[1], [0], [0], [1], [0, 0, 1, 1], [], []>} : vector<8x8xf32>, vector<8x32xf32>, vector<8x32xf32> -> vector<8x32xf32>
    %c0_34 = arith.constant 0 : index
    %c0_35 = arith.constant 0 : index
    %41 = vector.load %arg5[%c0_34, %c0_35] : memref<1x32xf32, #tpu.memory_space<vmem>>, vector<1x32xf32>
    %42 = vector.broadcast %41 : vector<1x32xf32> to vector<8x32xf32>
    %43 = arith.addf %40, %42 : vector<8x32xf32>
    %c0_36 = arith.constant 0 : index
    %c0_37 = arith.constant 0 : index
    %44 = vector.load %arg12[%c0_36, %c0_37] : memref<8x32xf32, #tpu.memory_space<vmem>>, vector<8x32xf32>
    tpu.vector_store %arg12[%c0_36, %c0_37], %43 {strides = array<i32>} : memref<8x32xf32, #tpu.memory_space<vmem>>, vector<8x32xf32>,
    return
  }
  func.func @transform_0(%arg0: i32) -> (i32, i32) {
    %c0_i32 = arith.constant 0 : i32
    %c0_i32_0 = arith.constant 0 : i32
    return %arg0, %c0_i32 : i32, i32
  }
  func.func @transform_1(%arg0: i32) -> (i32, i32) {
    %c0_i32 = arith.constant 0 : i32
    %c0_i32_0 = arith.constant 0 : i32
    %c0_i32_1 = arith.constant 0 : i32
    return %c0_i32, %c0_i32_0 : i32, i32
  }
  func.func @transform_2(%arg0: i32) -> (i32, i32) {
    %c0_i32 = arith.constant 0 : i32
    %c0_i32_0 = arith.constant 0 : i32
    %c0_i32_1 = arith.constant 0 : i32
    return %c0_i32, %c0_i32_0 : i32, i32
  }
  func.func @transform_3(%arg0: i32) -> (i32, i32) {
    %c0_i32 = arith.constant 0 : i32
    %c0_i32_0 = arith.constant 0 : i32
    %c0_i32_1 = arith.constant 0 : i32
    return %c0_i32, %c0_i32_0 : i32, i32
  }
  func.func @transform_4(%arg0: i32) -> (i32, i32) {
    %c0_i32 = arith.constant 0 : i32
    %c0_i32_0 = arith.constant 0 : i32
    %c0_i32_1 = arith.constant 0 : i32
    return %c0_i32, %c0_i32_0 : i32, i32
  }
  func.func @transform_5(%arg0: i32) -> (i32, i32) {
    %c0_i32 = arith.constant 0 : i32
    %c0_i32_0 = arith.constant 0 : i32
    return %arg0, %c0_i32 : i32, i32
  }
  func.func @transform_6(%arg0: i32) -> (i32, i32) {
    %c0_i32 = arith.constant 0 : i32
    %c0_i32_0 = arith.constant 0 : i32
    return %arg0, %c0_i32 : i32, i32
  }
  func.func @transform_7(%arg0: i32) -> (i32, i32) {
    %c0_i32 = arith.constant 0 : i32
    %c0_i32_0 = arith.constant 0 : i32
    %c0_i32_1 = arith.constant 0 : i32
    return %c0_i32, %c0_i32_0 : i32, i32
  }
  func.func @transform_8(%arg0: i32) -> (i32, i32) {
    %c0_i32 = arith.constant 0 : i32
    %c0_i32_0 = arith.constant 0 : i32
    %c0_i32_1 = arith.constant 0 : i32
    return %c0_i32, %c0_i32_0 : i32, i32
  }
  func.func @transform_9(%arg0: i32) -> (i32, i32) {
    %c0_i32 = arith.constant 0 : i32
    %c0_i32_0 = arith.constant 0 : i32
    %c0_i32_1 = arith.constant 0 : i32
    return %c0_i32, %c0_i32_0 : i32, i32
  }
  func.func @transform_10(%arg0: i32) -> (i32, i32) {
    %c0_i32 = arith.constant 0 : i32
    %c0_i32_0 = arith.constant 0 : i32
    %c0_i32_1 = arith.constant 0 : i32
    return %c0_i32, %c0_i32_0 : i32, i32
  }
  func.func @transform_11(%arg0: i32) -> (i32, i32) {
    %c0_i32 = arith.constant 0 : i32
    %c0_i32_0 = arith.constant 0 : i32
    return %arg0, %c0_i32 : i32, i32
  }
  func.func @transform_12(%arg0: i32) -> (i32, i32) {
    %c0_i32 = arith.constant 0 : i32
    %c0_i32_0 = arith.constant 0 : i32
    return %arg0, %c0_i32 : i32, i32
  }
  func.func @transform_13(%arg0: i32) -> (i32, i32) {
    %c0_i32 = arith.constant 0 : i32
    %c0_i32_0 = arith.constant 0 : i32
    return %arg0, %c0_i32 : i32, i32
  }
}

</mosaic_0001>

<bundles_post_ra>
// kernel: recurrent_attention_layer.1
= control target key start
LH: loop header
LB: loop body
LE: loop exit
PB: predicated region body
PF: predicated region fallthrough
CT: control target
= control target key end

     0   :  { %v725_v1 = vmov 0.0   ;;  %vm726_vm0 = vmmov 0   ;;  %s887_s0 = inlined_call_operand.vmem [shape: f32[8,32], index: 0, kind: input, shape index: {}]   ;;  %s888_s1 = inlined_call_operand.vmem [shape: f32[32,24], index: 1, kind: input, shape index: {}]   ;;  %s889_s2 = inlined_call_operand.vmem [shape: f32[1,24], index: 2, kind: input, shape index: {}]   ;;  %s890_s3 = inlined_call_operand.vmem [shape: f32[8,32], index: 3, kind: input, shape index: {}]   ;;  %s891_s4 = inlined_call_operand.vmem [shape: f32[1,32], index: 4, kind: input, shape index: {}]   ;;  %s892_s5 = inlined_call_operand.vmem [shape: f32[8,16], index: 5, kind: input, shape index: {}, may-alias: {5,12}]   ;;  %s893_s6 = inlined_call_operand.vmem [shape: f32[8,8], index: 6, kind: input, shape index: {}, may-alias: {6,13}]   ;;  %s894_s7 = inlined_call_operand.vmem [shape: f32[8,16], index: 7, kind: input, shape index: {}]   ;;  %s895_s8 = inlined_call_operand.vmem [shape: f32[8,16], index: 8, kind: input, shape index: {}]   ;;  %s896_s9 = inlined_call_operand.vmem [shape: f32[16,8], index: 9, kind: input, shape index: {}]   ;;  %s897_s10 = inlined_call_operand.vmem [shape: f32[8,8], index: 10, kind: input, shape index: {}]   ;;  %s898_s11 = inlined_call_operand.hbm [shape: f32[8,32], index: 11, kind: output, shape index: {0}]   ;;  %s899_s12 = inlined_call_operand.vmem [shape: f32[8,16], index: 12, kind: output, shape index: {1}, may-alias: {5,12}]   ;;  %s900_s13 = inlined_call_operand.vmem [shape: f32[8,8], index: 13, kind: output, shape index: {2}, may-alias: {6,13}]  }
   0x1   :  { %v46_v0 = vld [vmem:[%s888_s1 + $0x18] sm:$0xff]  ;;  %651 = vmatprep.subr.mxu0 %v725_v1  ;;  %v45_v2 = vld [vmem:[%s888_s1 + $0x10] sm:$0xff]  ;;  %659 = vmatprep.mubr.msk.f32.mxu0 %vm726_vm0, %v725_v1 }
   0x2   :  { %652 = vmatpush3.msra.mxu0 %v46_v0  ;;  %662 = vmatprep.subr.mxu1 %v725_v1 }
   0x3   :  { %19 = vsyncpa [#allocation3], 0  ;;  %653 = vmatprep.subr.mxu0 %v725_v1  ;;  %v44_v3 = vld [vmem:[%s888_s1 + $0x8] sm:$0xff]  ;;  %664 = vmatprep.mubr.msk.f32.mxu1 %vm726_vm0, %v725_v1  ;;  %v43_v4 = vld [vmem:[%s888_s1] sm:$0xff]  ;;  %vm54_vm1 = vcmask 261120   ;;  %s727_s20 = smov 120  }
   0x4   :  { %654 = vmatpush3.msra.mxu0 %v45_v2  ;;  %v42_v5 = vld [vmem:[%s887_s0] sm:$0xff]  ;;  %s728_s21 = smov 112   ;;  %vm139_vm3 = vcmask 64512   ;;  %v369_v22 = vld [vmem:[%s896_s9 + $0x8] sm:$0xff]  ;;  %vm365_vm4 = vcmask 130048   ;;  %s729_s16 = smov [#allocation2]  }
   0x5   :  { %655 = vmatprep.subr.mxu0 %v725_v1  ;;  %v141_v6 = vld [vmem:[%s894_s7] sm:$0xff] }
   0x6   :  { %656 = vmatpush3.msra.mxu0 %v44_v3  ;;  %663 = vmatpush3.msra.mxu1 %v141_v6  ;;  %v624_v7 = vld [vmem:[%s889_s2] ss:$0 sm:$0xff] }
   0x7   :  { %657 = vmatprep.subr.mxu0 %v725_v1  ;;  %667 = vmatprep.subr.mxu1 %v725_v1  ;;  %v133_v15 = vld [vmem:[%s893_s6] sm:$0xff] }
   0x8   :  { %658 = vmatpush3.msra.mxu0 %v43_v4  ;;  %v286_v18 = vld [vmem:[%s895_s8] sm:$0xff] }
   0x9   :  { %660 = vmatmul.mubr.msk.f32.vlgmr.msra.gmra.mxu0 %vm54_vm1, %v42_v5  ;;  %677 = vmatprep.subr.mxu0 %v725_v1  ;;  %v444_v19 = vld [vmem:[%s897_s10] sm:$0xff] }
   0xa   :  { %681 = vmatprep.mubr.msk.f32.mxu0 %vm726_vm0, %v725_v1  ;;  %678 = vmatpush3.msra.mxu0 %v369_v22  ;;  %v368_v23 = vld [vmem:[%s896_s9] sm:$0xff] }
   0xb   :  { %679 = vmatprep.subr.mxu0 %v725_v1  ;;  %v362_v29 = vld [vmem:[%s892_s5] sm:$0xff] }
   0xc   :  { %680 = vmatpush3.msra.mxu0 %v368_v23  ;;  %v520_v35 = vld [vmem:[%s890_s3] sm:$0xff]  ;;  %s608_s3 = sshll.u32 %s729_s16, 4  ;;  %s609_s3 = int_to_ptr.vmem [resolvable:$true] %s608_s3 }
   0xd   :  { %689 = vmatprep.subr.mxu0 %v725_v1  ;;  %v631_v42 = vld [vmem:[%s891_s4] ss:$0 sm:$0xff]  ;;  %s703_s17 = scalar_lea.vmem %s609_s3, 128  ;;  %p708_p1 = scmp.lt.s32.totalorder %s609_s3, %s609_s3 }
   0xe   :  { %p704_p0 = scmp.ne.s32.totalorder %s609_s3, %s703_s17  ;;  %p709_p2 = scmp.lt.s32.totalorder %s703_s17, %s703_s17 }
  0x10   :  { %p710_p3 = por %p709_p2, %p708_p1 }
  0x12   :  { %p711_p4 = pnand %p710_p3, %p704_p0 }
  0xc9   :  { %v124_v8 = vpop.f32.mrf.mxu0 }
  0xca   :  { %v125_v9 = vadd.f32 %v624_v7, %v124_v8 }
  0xcb   :  { %v661_v10 = vpop.f32.mrf.mxu0 }
  0xcc   :  { %v130_v11 = vmul.f32 1.442695, %v125_v9  ;;  %v129_v12 = vadd.f32 1.0, %v125_v9  ;;  %vm128_vm2 = vcmp.gt.f32.partialorder %v125_v9, 0.0 }
  0xce   :  { %699 = vpow2.f32 %v130_v11 }
  0xdb   :  { %v700_v13 = vpop.eup %699 }
  0xdc   :  { %v132_v14 = vsel %vm128_vm2, %v129_v12, %v700_v13 }
  0xdd   :  { %135 = vrot.lane.b32.xlu0 %v132_v14, %s727_s20 }
  0xe1   :  { %288 = vrot.lane.b32.xlu0 %v125_v9, %s728_s21 }
 0x14f   :  { %v136_v16 = vpop.permute.xlu0 %135 }
 0x150   :  { %v138_v17 = vadd.f32 %v136_v16, %v133_v15  ;;  %665 = vmatmul.mubr.msk.f32.vlgmr.msra.gmra.mxu1 %vm139_vm3, %v136_v16 }
 0x151   :  { %668 = vmatpush3.msra.mxu1 %v141_v6  ;;  %669 = vmatprep.mubr.msk.f32.mxu1 %vm726_vm0, %v725_v1 }
 0x152   :  { %140 = vst.msk [vmem:[%s900_s13] sm:$0xff] %vm139_vm3, %v138_v17  ;;  %672 = vmatprep.subr.mxu1 %v725_v1  ;;  %v443_v21 = vmul.f32 %v138_v17, %v132_v14 }
 0x153   :  { %v289_v20 = vpop.permute.xlu0 %288 }
 0x154   :  { %670 = vmatmul.mubr.msk.f32.vlgmr.msra.gmra.mxu1 %vm139_vm3, %v132_v14 }
 0x155   :  { %673 = vmatpush3.msra.mxu1 %v286_v18  ;;  %674 = vmatprep.mubr.msk.f32.mxu1 %vm726_vm0, %v725_v1 }
 0x156   :  { %684 = vmatprep.subr.mxu1 %v725_v1 }
 0x158   :  { %675 = vmatmul.mubr.msk.f32.vlgmr.msra.gmra.mxu1 %vm139_vm3, %v289_v20 }
 0x159   :  { %685 = vmatpush3.msra.mxu1 %v444_v19  ;;  %686 = vmatprep.mubr.msk.f32.mxu1 %vm726_vm0, %v725_v1 }
 0x15c   :  { %687 = vmatmul.mubr.msk.f32.vlgmr.msra.gmra.mxu1 %vm139_vm3, %v443_v21 }
 0x210   :  { %v210_v24 = vpop.f32.mrf.mxu1 }
 0x212   :  { %v666_v25 = vpop.f32.mrf.mxu1 }
 0x214   :  { %v282_v26 = vpop.f32.mrf.mxu1 }
 0x216   :  { %v671_v27 = vpop.f32.mrf.mxu1 }
 0x218   :  { %v358_v28 = vpop.f32.mrf.mxu1 }
 0x219   :  { %v363_v30 = vmul.f32 %v358_v28, %v210_v24 }
 0x21a   :  { %v676_v31 = vpop.f32.mrf.mxu1 }
 0x21b   :  { %v364_v32 = vadd.f32 %v363_v30, %v362_v29 }
 0x21c   :  { %v514_v33 = vpop.f32.mrf.mxu1 }
 0x21d   :  { %366 = vst.msk [vmem:[%s899_s12] sm:$0xff] %vm365_vm4, %v364_v32  ;;  %v367_v34 = vmul.f32 %v364_v32, %v282_v26  ;;  %v515_v37 = vadd.f32 1e-06, %v514_v33 }
 0x21e   :  { %v688_v36 = vpop.f32.mrf.mxu1 }
 0x21f   :  { %682 = vmatmul.mubr.msk.f32.vlgmr.msra.gmra.mxu0 %vm365_vm4, %v367_v34  ;;  %701 = vrcp.f32 %v515_v37 }
 0x220   :  { %690 = vmatpush3.msra.mxu0 %v520_v35  ;;  %691 = vmatprep.mubr.msk.f32.mxu0 %vm726_vm0, %v725_v1 }
 0x22c   :  { %v702_v38 = vpop.eup %701 }
 0x2df   :  { %v439_v39 = vpop.f32.mrf.mxu0 }
 0x2e0   :  { %v519_v40 = vmul.f32 %v702_v38, %v439_v39 }
 0x2e1   :  { %v683_v41 = vpop.f32.mrf.mxu0 }
 0x2e2   :  { %692 = vmatmul.mubr.msk.f32.vlgmr.msra.gmra.mxu0 %vm139_vm3, %v519_v40 }
 0x3a2   :  { %v597_v43 = vpop.f32.mrf.mxu0 }
 0x3a3   :  { %v598_v44 = vadd.f32 %v631_v42, %v597_v43 }
 0x3a4   :  { %v693_v45 = vpop.f32.mrf.mxu0 }
 0x3a5   :  { %601 = vst.msk [vmem:[#allocation2] sm:$0xff] %vm54_vm1, %v598_v44 }
 0x3a6   :  { %714 = shalt.err (!%p711_p4)
}
 0x3a7   :  { %611 = dma.vmem_to_hbm [thread:$0]  %s609_s3, 128, %s898_s11, [#allocation3]  }
 0x3a8   :  { %723 = dma.done.wait [#allocation3], 128  }
 0x3a9   :  { %724 = vsyncadd [#allocation3], 4294967168 }
 0x3aa   :  { %623 = vsyncpa [#allocation3], 1 }

</bundles_post_ra>
